<compile_context>
chip_gen: v6e
topology: v6e:2x2x1
jax: 0.10.0
libtpu: 0.0.40
codegen_flags: <defaults>
</compile_context>

<pallas_src>
import jax
import jax.numpy as jnp
from jax.experimental import pallas as pl
from jax.experimental.pallas import tpu as pltpu


def _radon_weights_kernel(w_hbm, o_hbm, copy_sem):
    # forward() == return self.weight  ->  one direct HBM->HBM DMA.
    cp = pltpu.make_async_copy(w_hbm, o_hbm, copy_sem)
    cp.start()
    cp.wait()


def radon_weights_forward(weight: jax.Array) -> jax.Array:
    """Pallas implementation of RadonWeightsModule.forward()."""
    return pl.pallas_call(
        _radon_weights_kernel,
        out_shape=jax.ShapeDtypeStruct(weight.shape, weight.dtype),
        # Leave both operands in HBM; the kernel moves data with one DMA.
        in_specs=[pl.BlockSpec(memory_space=pl.ANY)],
        out_specs=pl.BlockSpec(memory_space=pl.ANY),
        scratch_shapes=[pltpu.SemaphoreType.DMA],
    )(weight)


if __name__ == "__main__":
    # TODO(synk): nn.Parameter initialization (zeros) is host-side state, not a
    # kernel concern; we fill with deterministic random values so the copy is a
    # meaningful check.
    key = jax.random.PRNGKey(0)

    # Small shape matching the module spec.
    width = 32
    weight = jax.random.normal(key, (width, width), dtype=jnp.float32)
    out = radon_weights_forward(weight)
    out = jax.block_until_ready(out)
    assert out.shape == (width, width)
    assert out.dtype == jnp.float32
    assert bool(jnp.array_equal(out, weight))

    # A second, lane-dense width to confirm the DMA path is shape-agnostic.
    width2 = 256
    weight2 = jax.random.normal(jax.random.PRNGKey(1), (width2, width2), dtype=jnp.float32)
    out2 = jax.block_until_ready(radon_weights_forward(weight2))
    assert bool(jnp.array_equal(out2, weight2))

    print("KERNEL_OK")
</pallas_src>

<mosaic_0001>
module attributes {stable_mosaic.version = 11 : i64} {
  func.func @_radon_weights_kernel(%arg0: memref<32x32xf32, #tpu.memory_space<any>>, %arg1: memref<32x32xf32, #tpu.memory_space<any>>, %arg2: memref<!tpu.dma_semaphore, #tpu.memory_space<semaphore_mem>>) attributes {dimension_semantics = [], scalar_prefetch = 0 : i64, scratch_operands = 1 : i64, tpu.core_type = #tpu.core_type<tc>} {
    tpu.enqueue_dma source(%arg0 : memref<32x32xf32, #tpu.memory_space<any>>) target(%arg1 : memref<32x32xf32, #tpu.memory_space<any>>) target_semaphore(%arg2 : memref<!tpu.dma_semaphore, #tpu.memory_space<semaphore_mem>>)
    tpu.wait_dma2 semaphore(%arg2 : memref<!tpu.dma_semaphore, #tpu.memory_space<semaphore_mem>>) src(%arg0 : memref<32x32xf32, #tpu.memory_space<any>>) dst(%arg1 : memref<32x32xf32, #tpu.memory_space<any>>)
    return
  }
}

</mosaic_0001>

<bundles_post_ra>
// kernel: tpu_custom_call.1
= control target key start
LH: loop header
LB: loop body
LE: loop exit
PB: predicated region body
PF: predicated region fallthrough
CT: control target
= control target key end

     0   :  { %s28_s6 = smov [#allocation2]   ;;  %s29_s7 = smov 131072   ;;  %s47_s0 = inlined_call_operand.hbm [shape: f32[32,32], index: 0, kind: input, shape index: {}]   ;;  %s48_s1 = inlined_call_operand.hbm [shape: f32[32,32], index: 1, kind: output, shape index: {}]  }
   0x1   :  { %s30_s8 = smov 0  }
   0x2   :  { %12 = dma.general %s47_s0, 512, %s48_s1, %s28_s6, %s29_s7, [#allocation4], %s30_s8, 0  }
   0x3   :  { %26 = dma.done.wait [#allocation2], 512 }
   0x4   :  { %27 = vsyncadd [#allocation2], 4294966784 }
   0x5   :  { %16 = vsyncmov [#allocation2] }
   0x8   :  { %s17_s13 = vpop.sfrf %16 }
   0x9   :  { %p22_p0 = scmp.ne.s32.totalorder %s17_s13, 0 }
   0xb   :  { %21 = shalt.err (%p22_p0)  }

</bundles_post_ra>
